<compile_context>
chip_gen: v6e
topology: v6e:2x2x1
jax: 0.10.0
libtpu: 0.0.40
codegen_flags: <defaults>
</compile_context>

<pallas_src>
import functools
import math

import jax
import jax.numpy as jnp
from jax import lax
from jax.experimental import pallas as pl
from jax.experimental.pallas import tpu as pltpu

EPS = 1e-5
KSIZE = 3


def conv_bn_relu_kernel(x_ref, w_ref, gb_ref, o_ref, pad_ref, *,
                        n, h, w, cin, cout, ksize):
    """x_ref:  (N, H, W*Cin)        packed NHWC input (unpadded)
       w_ref:  (K, W*Cin, W*Cout)   block-Toeplitz weight slabs (W-padding folded in)
       gb_ref: (2, Cout)            row0 = gamma, row1 = beta
       o_ref:  (N*H, W*Cout)        lane-dense output
       pad_ref:(N, H+2, W*Cin)      VMEM scratch holding the H-halo'd input"""
    f32 = jnp.float32
    wc = w * cin
    wo = w * cout
    nh = n * h

    # ---- padding=1 in H fused in-kernel: zero only the two halo rows per batch ----
    pad_ref[:, 0:1, :] = jnp.zeros((n, 1, wc), f32)
    pad_ref[:, h + 1:h + 2, :] = jnp.zeros((n, 1, wc), f32)
    pad_ref[:, 1:h + 1, :] = x_ref[...]

    # ---- conv: 3 block-Toeplitz MXU matmuls; first one initializes the accumulator ----
    y = jnp.dot(pad_ref[:, 0:h, :].reshape(nh, wc), w_ref[0],
                preferred_element_type=f32)
    for kh in range(1, ksize):
        y = y + jnp.dot(pad_ref[:, kh:kh + h, :].reshape(nh, wc), w_ref[kh],
                        preferred_element_type=f32)

    # ---- BatchNorm2d (training mode: batch stats, biased variance) on the MXU ----
    inv_cnt = 1.0 / float(n * h * w)
    ones_row = jnp.ones((1, nh), f32)
    s1 = jnp.dot(ones_row, y, preferred_element_type=f32)        # (1, W*Cout)  sum y
    s2 = jnp.dot(ones_row, y * y, preferred_element_type=f32)    # (1, W*Cout)  sum y^2
    s12 = jnp.concatenate([s1, s2], axis=0)                      # (2, W*Cout)

    # lane -> channel fold matrix built in-kernel (no DMA): r[l, c] = (l % Cout == c)
    lane_r = lax.broadcasted_iota(jnp.int32, (wo, cout), 0)
    ch_r = lax.broadcasted_iota(jnp.int32, (wo, cout), 1)
    r_mat = (lane_r % cout == ch_r).astype(f32)                  # (W*Cout, Cout)
    sc = jnp.dot(s12, r_mat, preferred_element_type=f32) * inv_cnt   # (2, Cout)

    mean_c = sc[0:1, :]
    var_c = sc[1:2, :] - mean_c * mean_c                         # E[y^2] - mean^2
    scale_c = gb_ref[0:1, :] * lax.rsqrt(var_c + EPS)            # gamma / sqrt(var+eps)
    bias_c = gb_ref[1:2, :] - mean_c * scale_c                   # beta - mean * scale
    sb = jnp.concatenate([scale_c, bias_c], axis=0)              # (2, Cout)

    # channel -> lane broadcast matrix: rt[c, l] = (l % Cout == c)
    ch_b = lax.broadcasted_iota(jnp.int32, (cout, wo), 0)
    lane_b = lax.broadcasted_iota(jnp.int32, (cout, wo), 1)
    rt_mat = (lane_b % cout == ch_b).astype(f32)                 # (Cout, W*Cout)
    sb_l = jnp.dot(sb, rt_mat, preferred_element_type=f32)       # (2, W*Cout)

    # ---- affine + ReLU + unmasked full-vreg writeback ----
    o_ref[...] = jnp.maximum(y * sb_l[0:1, :] + sb_l[1:2, :], 0.0).astype(o_ref.dtype)


def conv_basic_forward(x_nchw, w_oihw, gamma, beta):
    N, Cin, H, W = x_nchw.shape
    Cout, _, KH, KW = w_oihw.shape
    f32 = jnp.float32

    # ---- wrapper-side layout plumbing (one-off, jit-time) ----
    # input: NCHW -> packed NHWC (N, H, W*Cin); lane axis is W*Cin.
    x_pk = jnp.transpose(x_nchw, (0, 2, 3, 1)).reshape(N, H, W * Cin).astype(f32)

    # block-Toeplitz weight slabs with the W-direction padding folded in:
    #   w_blk[kh, wi*Cin + c, j*Cout + o] = w[o, c, kh, wi - j + 1]   (0 if kw out of range)
    w_t = jnp.transpose(w_oihw, (2, 3, 1, 0)).astype(f32)        # (KH, KW, Cin, Cout)
    wi = jnp.arange(W)[:, None]                                  # input column
    jo = jnp.arange(W)[None, :]                                  # output column
    kw_idx = wi - jo + 1                                         # (W, W)
    valid = ((kw_idx >= 0) & (kw_idx < KW)).astype(f32)
    blk = w_t[:, jnp.clip(kw_idx, 0, KW - 1), :, :]              # (KH, W, W, Cin, Cout)
    blk = blk * valid[None, :, :, None, None]
    w_blk = jnp.transpose(blk, (0, 1, 3, 2, 4)).reshape(KH, W * Cin, W * Cout)

    gb = jnp.stack([gamma.astype(f32), beta.astype(f32)], axis=0)  # (2, Cout)

    kernel = functools.partial(conv_bn_relu_kernel, n=N, h=H, w=W,
                               cin=Cin, cout=Cout, ksize=KH)

    out2d = pl.pallas_call(
        kernel,
        out_shape=jax.ShapeDtypeStruct((N * H, W * Cout), f32),
        grid=(1,),
        in_specs=[
            pl.BlockSpec((N, H, W * Cin), lambda i: (0, 0, 0)),
            pl.BlockSpec((KH, W * Cin, W * Cout), lambda i: (0, 0, 0)),
            pl.BlockSpec((2, Cout), lambda i: (0, 0)),
        ],
        out_specs=pl.BlockSpec((N * H, W * Cout), lambda i: (0, 0)),
        scratch_shapes=[pltpu.VMEM((N, H + 2, W * Cin), f32)],
        compiler_params=pltpu.CompilerParams(
            dimension_semantics=("arbitrary",)),
    )(x_pk, w_blk, gb)

    # unpack lane-dense output: (N*H, W*Cout) -> NCHW
    return jnp.transpose(out2d.reshape(N, H, W, Cout), (0, 3, 1, 2))


def reference_forward(x_nchw, w_oihw, gamma, beta):
    """Pure-JAX reference matching the PyTorch module (training-mode BN)."""
    y = jax.lax.conv_general_dilated(
        x_nchw.astype(jnp.float32), w_oihw.astype(jnp.float32),
        window_strides=(1, 1), padding=((1, 1), (1, 1)),
        dimension_numbers=("NCHW", "OIHW", "NCHW"))
    mean = jnp.mean(y, axis=(0, 2, 3), keepdims=True)
    var = jnp.mean(jnp.square(y - mean), axis=(0, 2, 3), keepdims=True)
    y = (y - mean) * jax.lax.rsqrt(var + EPS)
    y = y * gamma.reshape(1, -1, 1, 1) + beta.reshape(1, -1, 1, 1)
    return jnp.maximum(y, 0.0)


if __name__ == "__main__":
    # shapes consistent with the module: ConvBasic(nIn=4, nOut=8)
    N, Cin, H, W = 2, 4, 16, 16
    Cout = 8

    key = jax.random.PRNGKey(0)
    kx, kw = jax.random.split(key, 2)
    x = jax.random.normal(kx, (N, Cin, H, W), dtype=jnp.float32)

    # deterministic Conv2d weight init (kaiming-style scale), no bias
    fan = Cin * KSIZE * KSIZE
    w = jax.random.normal(kw, (Cout, Cin, KSIZE, KSIZE),
                          dtype=jnp.float32) * math.sqrt(2.0 / fan)
    # BatchNorm2d default affine init
    gamma = jnp.ones((Cout,), jnp.float32)
    beta = jnp.zeros((Cout,), jnp.float32)

    out = conv_basic_forward(x, w, gamma, beta)
    out = jax.block_until_ready(out)

    ref = jax.block_until_ready(reference_forward(x, w, gamma, beta))
    assert out.shape == (N, Cout, H, W), out.shape
    assert jnp.allclose(out, ref, atol=1e-4, rtol=1e-4), (
        float(jnp.max(jnp.abs(out - ref))))

    print("KERNEL_OK")
</pallas_src>

<mosaic_0001>
module attributes {stable_mosaic.version = 11 : i64} {
  func.func @conv_bn_relu_kernel(%arg0: i32, %arg1: memref<2x16x64xf32, #tpu.memory_space<vmem>>, %arg2: memref<3x64x128xf32, #tpu.memory_space<vmem>>, %arg3: memref<2x8xf32, #tpu.memory_space<vmem>>, %arg4: memref<32x128xf32, #tpu.memory_space<vmem>>, %arg5: memref<2x18x64xf32, #tpu.memory_space<vmem>>) attributes {dimension_semantics = [#tpu.dimension_semantics<arbitrary>], iteration_bounds = array<i64: 1>, scalar_prefetch = 0 : i64, scratch_operands = 1 : i64, tpu.core_type = #tpu.core_type<tc>, window_params = [{pipeline_mode = #tpu.pipeline_mode<synchronous>, transform_indices = @transform_0, window_bounds = array<i64: 2, 16, 64>}, {pipeline_mode = #tpu.pipeline_mode<synchronous>, transform_indices = @transform_1, window_bounds = array<i64: 3, 64, 128>}, {pipeline_mode = #tpu.pipeline_mode<synchronous>, transform_indices = @transform_2, window_bounds = array<i64: 2, 8>}, {pipeline_mode = #tpu.pipeline_mode<synchronous>, transform_indices = @transform_3, window_bounds = array<i64: 32, 128>}]} {
    %cst = arith.constant 0.000000e+00 : f32
    %0 = vector.broadcast %cst : f32 to vector<2x1x64xf32>
    %c0 = arith.constant 0 : index
    %c0_0 = arith.constant 0 : index
    %c0_1 = arith.constant 0 : index
    %1 = vector.load %arg5[%c0, %c0_0, %c0_1] : memref<2x18x64xf32, #tpu.memory_space<vmem>>, vector<2x1x64xf32>
    tpu.vector_store %arg5[%c0, %c0_0, %c0_1], %0 {strides = array<i32>} : memref<2x18x64xf32, #tpu.memory_space<vmem>>, vector<2x1x64xf32>,
    %cst_2 = arith.constant 0.000000e+00 : f32
    %2 = vector.broadcast %cst_2 : f32 to vector<2x1x64xf32>
    %c0_3 = arith.constant 0 : index
    %c17 = arith.constant 17 : index
    %c0_4 = arith.constant 0 : index
    %3 = vector.load %arg5[%c0_3, %c17, %c0_4] : memref<2x18x64xf32, #tpu.memory_space<vmem>>, vector<2x1x64xf32>
    tpu.vector_store %arg5[%c0_3, %c17, %c0_4], %2 {strides = array<i32>} : memref<2x18x64xf32, #tpu.memory_space<vmem>>, vector<2x1x64xf32>,
    %c0_5 = arith.constant 0 : index
    %c0_6 = arith.constant 0 : index
    %c0_7 = arith.constant 0 : index
    %4 = vector.load %arg1[%c0_5, %c0_6, %c0_7] : memref<2x16x64xf32, #tpu.memory_space<vmem>>, vector<2x16x64xf32>
    %c0_8 = arith.constant 0 : index
    %c1 = arith.constant 1 : index
    %c0_9 = arith.constant 0 : index
    %5 = vector.load %arg5[%c0_8, %c1, %c0_9] : memref<2x18x64xf32, #tpu.memory_space<vmem>>, vector<2x16x64xf32>
    tpu.vector_store %arg5[%c0_8, %c1, %c0_9], %4 {strides = array<i32>} : memref<2x18x64xf32, #tpu.memory_space<vmem>>, vector<2x16x64xf32>,
    %c0_10 = arith.constant 0 : index
    %c0_11 = arith.constant 0 : index
    %c0_12 = arith.constant 0 : index
    %6 = vector.load %arg5[%c0_10, %c0_11, %c0_12] : memref<2x18x64xf32, #tpu.memory_space<vmem>>, vector<2x16x64xf32>
    %7 = vector.shape_cast %6 : vector<2x16x64xf32> to vector<32x64xf32>
    %c0_13 = arith.constant 0 : index
    %c0_14 = arith.constant 0 : index
    %c0_15 = arith.constant 0 : index
    %8 = vector.load %arg2[%c0_13, %c0_14, %c0_15] : memref<3x64x128xf32, #tpu.memory_space<vmem>>, vector<1x64x128xf32>
    %9 = vector.shape_cast %8 : vector<1x64x128xf32> to vector<64x128xf32>
    %cst_16 = arith.constant dense<0.000000e+00> : vector<32x128xf32>
    %10 = tpu.matmul %7, %9, %cst_16 {dimension_numbers = #tpu.dot_dimension_numbers<[1], [0], [0], [1], [0, 0, 1, 1], [], []>} : vector<32x64xf32>, vector<64x128xf32>, vector<32x128xf32> -> vector<32x128xf32>
    %c0_17 = arith.constant 0 : index
    %c1_18 = arith.constant 1 : index
    %c0_19 = arith.constant 0 : index
    %11 = vector.load %arg5[%c0_17, %c1_18, %c0_19] : memref<2x18x64xf32, #tpu.memory_space<vmem>>, vector<2x16x64xf32>
    %12 = vector.shape_cast %11 : vector<2x16x64xf32> to vector<32x64xf32>
    %c1_20 = arith.constant 1 : index
    %c0_21 = arith.constant 0 : index
    %c0_22 = arith.constant 0 : index
    %13 = vector.load %arg2[%c1_20, %c0_21, %c0_22] : memref<3x64x128xf32, #tpu.memory_space<vmem>>, vector<1x64x128xf32>
    %14 = vector.shape_cast %13 : vector<1x64x128xf32> to vector<64x128xf32>
    %cst_23 = arith.constant dense<0.000000e+00> : vector<32x128xf32>
    %15 = tpu.matmul %12, %14, %cst_23 {dimension_numbers = #tpu.dot_dimension_numbers<[1], [0], [0], [1], [0, 0, 1, 1], [], []>} : vector<32x64xf32>, vector<64x128xf32>, vector<32x128xf32> -> vector<32x128xf32>
    %16 = arith.addf %10, %15 : vector<32x128xf32>
    %c0_24 = arith.constant 0 : index
    %c2 = arith.constant 2 : index
    %c0_25 = arith.constant 0 : index
    %17 = vector.load %arg5[%c0_24, %c2, %c0_25] : memref<2x18x64xf32, #tpu.memory_space<vmem>>, vector<2x16x64xf32>
    %18 = vector.shape_cast %17 : vector<2x16x64xf32> to vector<32x64xf32>
    %c2_26 = arith.constant 2 : index
    %c0_27 = arith.constant 0 : index
    %c0_28 = arith.constant 0 : index
    %19 = vector.load %arg2[%c2_26, %c0_27, %c0_28] : memref<3x64x128xf32, #tpu.memory_space<vmem>>, vector<1x64x128xf32>
    %20 = vector.shape_cast %19 : vector<1x64x128xf32> to vector<64x128xf32>
    %cst_29 = arith.constant dense<0.000000e+00> : vector<32x128xf32>
    %21 = tpu.matmul %18, %20, %cst_29 {dimension_numbers = #tpu.dot_dimension_numbers<[1], [0], [0], [1], [0, 0, 1, 1], [], []>} : vector<32x64xf32>, vector<64x128xf32>, vector<32x128xf32> -> vector<32x128xf32>
    %22 = arith.addf %16, %21 : vector<32x128xf32>
    %cst_30 = arith.constant 1.000000e+00 : f32
    %23 = vector.broadcast %cst_30 : f32 to vector<1x32xf32>
    %cst_31 = arith.constant dense<0.000000e+00> : vector<1x128xf32>
    %24 = tpu.matmul %23, %22, %cst_31 {dimension_numbers = #tpu.dot_dimension_numbers<[1], [0], [0], [1], [0, 0, 1, 1], [], []>} : vector<1x32xf32>, vector<32x128xf32>, vector<1x128xf32> -> vector<1x128xf32>
    %25 = arith.mulf %22, %22 : vector<32x128xf32>
    %cst_32 = arith.constant dense<0.000000e+00> : vector<1x128xf32>
    %26 = tpu.matmul %23, %25, %cst_32 {dimension_numbers = #tpu.dot_dimension_numbers<[1], [0], [0], [1], [0, 0, 1, 1], [], []>} : vector<1x32xf32>, vector<32x128xf32>, vector<1x128xf32> -> vector<1x128xf32>
    %27 = tpu.concatenate %24, %26 in 0 : vector<1x128xf32>, vector<1x128xf32> -> vector<2x128xf32>
    %28 = tpu.iota {dimensions = array<i32: 0>} : vector<128x8xi32>
    %29 = tpu.iota {dimensions = array<i32: 1>} : vector<128x8xi32>
    %c8_i32 = arith.constant 8 : i32
    %c0_i32 = arith.constant 0 : i32
    %30 = arith.cmpi eq, %c8_i32, %c0_i32 : i32
    %c1_i32 = arith.constant 1 : i32
    %31 = arith.select %30, %c1_i32, %c8_i32 : i32
    %32 = vector.broadcast %31 : i32 to vector<128x8xi32>
    %33 = arith.remsi %28, %32 : vector<128x8xi32>
    %c0_i32_33 = arith.constant 0 : i32
    %34 = vector.broadcast %c0_i32_33 : i32 to vector<128x8xi32>
    %35 = arith.cmpi ne, %33, %34 : vector<128x8xi32>
    %c0_i32_34 = arith.constant 0 : i32
    %36 = vector.broadcast %c0_i32_34 : i32 to vector<128x8xi32>
    %37 = arith.cmpi slt, %33, %36 : vector<128x8xi32>
    %c0_i32_35 = arith.constant 0 : i32
    %38 = arith.cmpi slt, %31, %c0_i32_35 : i32
    %39 = vector.broadcast %38 : i1 to vector<128x8xi1>
    %40 = vector.broadcast %39 : vector<128x8xi1> to vector<128x8xi1>
    %41 = arith.xori %37, %40 : vector<128x8xi1>
    %42 = arith.andi %41, %35 : vector<128x8xi1>
    %43 = vector.broadcast %31 : i32 to vector<128x8xi32>
    %44 = arith.addi %33, %43 : vector<128x8xi32>
    %45 = arith.select %42, %44, %33 : vector<128x8xi1>, vector<128x8xi32>
    %46 = arith.cmpi eq, %45, %29 : vector<128x8xi32>
    %47 = arith.extui %46 : vector<128x8xi1> to vector<128x8xi32>
    %48 = arith.sitofp %47 : vector<128x8xi32> to vector<128x8xf32>
    %cst_36 = arith.constant dense<0.000000e+00> : vector<2x8xf32>
    %49 = tpu.matmul %27, %48, %cst_36 {dimension_numbers = #tpu.dot_dimension_numbers<[1], [0], [0], [1], [0, 0, 1, 1], [], []>} : vector<2x128xf32>, vector<128x8xf32>, vector<2x8xf32> -> vector<2x8xf32>
    %cst_37 = arith.constant 0.001953125 : f32
    %50 = vector.broadcast %cst_37 : f32 to vector<2x8xf32>
    %51 = arith.mulf %49, %50 : vector<2x8xf32>
    %52 = vector.extract_strided_slice %51 {offsets = [0, 0], sizes = [1, 8], strides = [1, 1]} : vector<2x8xf32> to vector<1x8xf32>
    %53 = vector.extract_strided_slice %51 {offsets = [1, 0], sizes = [1, 8], strides = [1, 1]} : vector<2x8xf32> to vector<1x8xf32>
    %54 = arith.mulf %52, %52 : vector<1x8xf32>
    %55 = arith.subf %53, %54 : vector<1x8xf32>
    %c0_38 = arith.constant 0 : index
    %c0_39 = arith.constant 0 : index
    %56 = vector.load %arg3[%c0_38, %c0_39] : memref<2x8xf32, #tpu.memory_space<vmem>>, vector<1x8xf32>
    %cst_40 = arith.constant 9.99999974E-6 : f32
    %57 = vector.broadcast %cst_40 : f32 to vector<1x8xf32>
    %58 = arith.addf %55, %57 : vector<1x8xf32>
    %59 = math.rsqrt %58 : vector<1x8xf32>
    %60 = arith.mulf %56, %59 : vector<1x8xf32>
    %c1_41 = arith.constant 1 : index
    %c0_42 = arith.constant 0 : index
    %61 = vector.load %arg3[%c1_41, %c0_42] : memref<2x8xf32, #tpu.memory_space<vmem>>, vector<1x8xf32>
    %62 = arith.mulf %52, %60 : vector<1x8xf32>
    %63 = arith.subf %61, %62 : vector<1x8xf32>
    %64 = tpu.concatenate %60, %63 in 0 : vector<1x8xf32>, vector<1x8xf32> -> vector<2x8xf32>
    %65 = tpu.iota {dimensions = array<i32: 0>} : vector<8x128xi32>
    %66 = tpu.iota {dimensions = array<i32: 1>} : vector<8x128xi32>
    %c8_i32_43 = arith.constant 8 : i32
    %c0_i32_44 = arith.constant 0 : i32
    %67 = arith.cmpi eq, %c8_i32_43, %c0_i32_44 : i32
    %c1_i32_45 = arith.constant 1 : i32
    %68 = arith.select %67, %c1_i32_45, %c8_i32_43 : i32
    %69 = vector.broadcast %68 : i32 to vector<8x128xi32>
    %70 = arith.remsi %66, %69 : vector<8x128xi32>
    %c0_i32_46 = arith.constant 0 : i32
    %71 = vector.broadcast %c0_i32_46 : i32 to vector<8x128xi32>
    %72 = arith.cmpi ne, %70, %71 : vector<8x128xi32>
    %c0_i32_47 = arith.constant 0 : i32
    %73 = vector.broadcast %c0_i32_47 : i32 to vector<8x128xi32>
    %74 = arith.cmpi slt, %70, %73 : vector<8x128xi32>
    %c0_i32_48 = arith.constant 0 : i32
    %75 = arith.cmpi slt, %68, %c0_i32_48 : i32
    %76 = vector.broadcast %75 : i1 to vector<8x128xi1>
    %77 = vector.broadcast %76 : vector<8x128xi1> to vector<8x128xi1>
    %78 = arith.xori %74, %77 : vector<8x128xi1>
    %79 = arith.andi %78, %72 : vector<8x128xi1>
    %80 = vector.broadcast %68 : i32 to vector<8x128xi32>
    %81 = arith.addi %70, %80 : vector<8x128xi32>
    %82 = arith.select %79, %81, %70 : vector<8x128xi1>, vector<8x128xi32>
    %83 = arith.cmpi eq, %82, %65 : vector<8x128xi32>
    %84 = arith.extui %83 : vector<8x128xi1> to vector<8x128xi32>
    %85 = arith.sitofp %84 : vector<8x128xi32> to vector<8x128xf32>
    %cst_49 = arith.constant dense<0.000000e+00> : vector<2x128xf32>
    %86 = tpu.matmul %64, %85, %cst_49 {dimension_numbers = #tpu.dot_dimension_numbers<[1], [0], [0], [1], [0, 0, 1, 1], [], []>} : vector<2x8xf32>, vector<8x128xf32>, vector<2x128xf32> -> vector<2x128xf32>
    %87 = vector.extract_strided_slice %86 {offsets = [0, 0], sizes = [1, 128], strides = [1, 1]} : vector<2x128xf32> to vector<1x128xf32>
    %88 = vector.broadcast %87 : vector<1x128xf32> to vector<32x128xf32>
    %89 = arith.mulf %22, %88 : vector<32x128xf32>
    %90 = vector.extract_strided_slice %86 {offsets = [1, 0], sizes = [1, 128], strides = [1, 1]} : vector<2x128xf32> to vector<1x128xf32>
    %91 = vector.broadcast %90 : vector<1x128xf32> to vector<32x128xf32>
    %92 = arith.addf %89, %91 : vector<32x128xf32>
    %cst_50 = arith.constant 0.000000e+00 : f32
    %93 = vector.broadcast %cst_50 : f32 to vector<32x128xf32>
    %94 = arith.maximumf %92, %93 : vector<32x128xf32>
    %c0_51 = arith.constant 0 : index
    %c0_52 = arith.constant 0 : index
    %95 = vector.load %arg4[%c0_51, %c0_52] : memref<32x128xf32, #tpu.memory_space<vmem>>, vector<32x128xf32>
    tpu.vector_store %arg4[%c0_51, %c0_52], %94 {strides = array<i32>} : memref<32x128xf32, #tpu.memory_space<vmem>>, vector<32x128xf32>,
    return
  }
  func.func @transform_0(%arg0: i32) -> (i32, i32, i32) {
    %c0_i32 = arith.constant 0 : i32
    %c0_i32_0 = arith.constant 0 : i32
    %c0_i32_1 = arith.constant 0 : i32
    %c0_i32_2 = arith.constant 0 : i32
    return %c0_i32, %c0_i32_0, %c0_i32_1 : i32, i32, i32
  }
  func.func @transform_1(%arg0: i32) -> (i32, i32, i32) {
    %c0_i32 = arith.constant 0 : i32
    %c0_i32_0 = arith.constant 0 : i32
    %c0_i32_1 = arith.constant 0 : i32
    %c0_i32_2 = arith.constant 0 : i32
    return %c0_i32, %c0_i32_0, %c0_i32_1 : i32, i32, i32
  }
  func.func @transform_2(%arg0: i32) -> (i32, i32) {
    %c0_i32 = arith.constant 0 : i32
    %c0_i32_0 = arith.constant 0 : i32
    %c0_i32_1 = arith.constant 0 : i32
    return %c0_i32, %c0_i32_0 : i32, i32
  }
  func.func @transform_3(%arg0: i32) -> (i32, i32) {
    %c0_i32 = arith.constant 0 : i32
    %c0_i32_0 = arith.constant 0 : i32
    %c0_i32_1 = arith.constant 0 : i32
    return %c0_i32, %c0_i32_0 : i32, i32
  }
}

</mosaic_0001>

<bundles_post_ra>
// kernel: tpu_custom_call.1
= control target key start
LH: loop header
LB: loop body
LE: loop exit
PB: predicated region body
PF: predicated region fallthrough
CT: control target
= control target key end

     0   :  { %8 = vsyncpa [#allocation4], 0  ;;  %s1533_s0 = inlined_call_operand.hbm [shape: f32[2,16,64], index: 0, kind: input, shape index: {}]   ;;  %s1534_s1 = inlined_call_operand.hbm [shape: f32[3,64,128], index: 1, kind: input, shape index: {}]   ;;  %s1535_s2 = inlined_call_operand.vmem [shape: f32[2,8], index: 2, kind: input, shape index: {}]   ;;  %s1536_s3 = inlined_call_operand.hbm [shape: f32[32,128], index: 3, kind: output, shape index: {}]  }
   0x1   :  { %9 = vsyncpa [#allocation7], 0 }
   0x2   :  { %10 = vsyncpa [#allocation5], 0  ;;  %s1341_s12 = smov [#allocation3]  }
   0x3   :  { %s16_s13 = sshll.u32 %s1341_s12, 4  ;;  %s17_s13 = int_to_ptr.vmem [resolvable:$true] %s16_s13 }
   0x4   :  { %s1283_s14 = scalar_lea.vmem %s17_s13, 512  ;;  %p1288_p1 = scmp.lt.s32.totalorder %s17_s13, %s17_s13 }
   0x5   :  { %p1284_p0 = scmp.ne.s32.totalorder %s17_s13, %s1283_s14  ;;  %p1289_p2 = scmp.lt.s32.totalorder %s1283_s14, %s1283_s14 }
   0x7   :  { %p1290_p3 = por %p1289_p2, %p1288_p1 }
   0x9   :  { %p1291_p4 = pnand %p1290_p3, %p1284_p0 }
   0xb   :  { %1294 = shalt.err (!%p1291_p4)
}
   0xc   :  { %s1342_s15 = smov 128   ;;  %s1343_s16 = smov 8  }
   0xd   :  { %22 = dma.hbm_to_vmem [thread:$0]  %s1533_s0, 512, %s17_s13, [#allocation4], %s1342_s15, %s1342_s15, %s1343_s16  }
   0xe   :  { %s1344_s19 = smov [#allocation6]  }
   0xf   :  { %s28_s20 = sshll.u32 %s1344_s19, 4  ;;  %s29_s20 = int_to_ptr.vmem [resolvable:$true] %s28_s20 }
  0x10   :  { %s1303_s21 = scalar_lea.vmem %s29_s20, 3072  ;;  %p1308_p6 = scmp.lt.s32.totalorder %s29_s20, %s29_s20 }
  0x11   :  { %p1304_p5 = scmp.ne.s32.totalorder %s29_s20, %s1303_s21  ;;  %p1309_p7 = scmp.lt.s32.totalorder %s1303_s21, %s1303_s21 }
  0x13   :  { %p1310_p8 = por %p1309_p7, %p1308_p6 }
  0x15   :  { %p1311_p9 = pnand %p1310_p8, %p1304_p5 }
  0x17   :  { %1314 = shalt.err (!%p1311_p9)
}
  0x18   :  { %34 = dma.hbm_to_vmem [thread:$0]  %s1534_s1, 3072, %s29_s20, [#allocation7], %s1342_s15, %s1342_s15, %s1343_s16  }
  0x19   :  { %1335 = dma.done.wait [#allocation4], 512  }
  0x1a   :  { %1336 = vsyncadd [#allocation4], 4294966784 }
  0x1b   :  { %1337 = dma.done.wait [#allocation7], 3072  }
  0x1c   :  { %1338 = vsyncadd [#allocation7], 4294964224  ;;  %vm43_vm0 = vcmask 516096   ;;  %v1345_v0 = vmov 0.0   ;;  %v81_v1 = vld [vmem:[#allocation6 + $0x78] sm:$0xff]  ;;  %v80_v2 = vld [vmem:[#allocation6 + $0x70] sm:$0xff]  ;;  %v543_v41 = vlaneseq }
  0x1d   :  { %44 = vst.msk [vmem:[#allocation2] sm:$0x1] %vm43_vm0, %v1345_v0  ;;  %45 = vst.msk [vmem:[#allocation2 + $0x18] sm:$0x1] %vm43_vm0, %v1345_v0  ;;  %vm52_vm1 = vcmask 523264   ;;  %1137 = vmatprep.subr.mxu1 %v81_v1  ;;  %v79_v3 = vld [vmem:[#allocation6 + $0x68] sm:$0xff] }
  0x1e   :  { %46 = vst.msk [vmem:[#allocation2 + $0x11] sm:$0x1] %vm43_vm0, %v1345_v0  ;;  %47 = vst.msk [vmem:[#allocation2 + $0x29] sm:$0x1] %vm43_vm0, %v1345_v0  ;;  %1138 = vmatpush3.msra.mxu1 %v81_v1  ;;  %v48_v4 = vld [vmem:[#allocation3] sm:$0xff]  ;;  %v49_v5 = vld [vmem:[#allocation3 + $0x8] sm:$0xff] }
  0x1f   :  { %1139 = vmatprep.subr.mxu1 %v80_v2  ;;  %53 = vst.msk [vmem:[#allocation2 + $0x1] sm:$0xff] %vm52_vm1, %v48_v4  ;;  %v288_v6 = vld [vmem:[#allocation6 + $0xb8] sm:$0xff]  ;;  %v78_v7 = vld [vmem:[#allocation6 + $0x60] sm:$0xff]  ;;  %54 = vst.msk [vmem:[#allocation2 + $0x9] sm:$0xff] %vm52_vm1, %v49_v5  ;;  %vm1346_vm2 = vmmov 0   ;;  %v1407_v42 = vshrl.u32 %v543_v41, 7 }
  0x20   :  { %1140 = vmatpush3.msra.mxu1 %v80_v2  ;;  %1181 = vmatprep.subr.mxu0 %v288_v6  ;;  %v287_v8 = vld [vmem:[#allocation6 + $0xb0] sm:$0xff]  ;;  %v286_v9 = vld [vmem:[#allocation6 + $0xa8] sm:$0xff]  ;;  %v77_v10 = vld [vmem:[#allocation6 + $0x58] sm:$0xff]  ;;  %v1409_v43 = vand.u32 127, %v543_v41  ;;  %v1347_v54 = vmov 1.0   ;;  %vm390_vm13 = vcmask 261120  }
  0x21   :  { %1141 = vmatprep.subr.mxu1 %v79_v3  ;;  %1182 = vmatpush3.msra.mxu0 %v288_v6  ;;  %v50_v11 = vld [vmem:[#allocation3 + $0x10] sm:$0xff]  ;;  %v285_v12 = vld [vmem:[#allocation6 + $0xa0] sm:$0xff]  ;;  %v51_v13 = vld [vmem:[#allocation3 + $0x18] sm:$0xff]  ;;  %v559_v44 = vadd.s32 120, %v1407_v42  ;;  %v558_v45 = vadd.s32 112, %v1407_v42  ;;  %v557_v46 = vadd.s32 104, %v1407_v42 }
  0x22   :  { %1142 = vmatpush3.msra.mxu1 %v79_v3  ;;  %1183 = vmatprep.subr.mxu0 %v287_v8  ;;  %55 = vst.msk [vmem:[#allocation2 + $0x19] sm:$0xff] %vm52_vm1, %v50_v11  ;;  %v76_v14 = vld [vmem:[#allocation6 + $0x50] sm:$0xff]  ;;  %56 = vst.msk [vmem:[#allocation2 + $0x21] sm:$0xff] %vm52_vm1, %v51_v13  ;;  %v75_v15 = vld [vmem:[#allocation6 + $0x48] sm:$0xff]  ;;  %v556_v47 = vadd.s32 96, %v1407_v42  ;;  %v555_v51 = vadd.s32 88, %v1407_v42 }
  0x23   :  { %1143 = vmatprep.subr.mxu1 %v78_v7  ;;  %1184 = vmatpush3.msra.mxu0 %v287_v8  ;;  %v284_v17 = vld [vmem:[#allocation6 + $0x98] sm:$0xff]  ;;  %v74_v18 = vld [vmem:[#allocation6 + $0x40] sm:$0xff]  ;;  %v283_v19 = vld [vmem:[#allocation6 + $0x90] sm:$0xff]  ;;  %v671_v48 = vand.u32 7, %v559_v44  ;;  %v664_v49 = vand.u32 7, %v558_v45  ;;  %v657_v50 = vand.u32 7, %v557_v46 }
  0x24   :  { %1144 = vmatpush3.msra.mxu1 %v78_v7  ;;  %1185 = vmatprep.subr.mxu0 %v286_v9  ;;  %v68_v21 = vld [vmem:[#allocation6 + $0x38] sm:$0xff]  ;;  %v67_v23 = vld [vmem:[#allocation6 + $0x30] sm:$0xff]  ;;  %v282_v24 = vld [vmem:[#allocation6 + $0x88] sm:$0xff]  ;;  %v650_v52 = vand.u32 7, %v556_v47  ;;  %v554_v53 = vadd.s32 80, %v1407_v42  ;;  %v643_v55 = vand.u32 7, %v555_v51 }
  0x25   :  { %1145 = vmatprep.subr.mxu1 %v77_v10  ;;  %1186 = vmatpush3.msra.mxu0 %v286_v9  ;;  %v66_v25 = vld [vmem:[#allocation6 + $0x28] sm:$0xff]  ;;  %v281_v27 = vld [vmem:[#allocation6 + $0x80] sm:$0xff]  ;;  %v64_v30 = vld [vmem:[#allocation6 + $0x18] sm:$0xff]  ;;  %vm769_vm3 = vcmp.eq.s32.totalorder %v671_v48, %v1409_v43  ;;  %vm768_vm4 = vcmp.eq.s32.totalorder %v664_v49, %v1409_v43  ;;  %vm767_vm5 = vcmp.eq.s32.totalorder %v657_v50, %v1409_v43  ;;  %v553_v56 = vadd.s32 72, %v1407_v42 }
  0x26   :  { %1146 = vmatpush3.msra.mxu1 %v77_v10  ;;  %v69_v16 = vld [vmem:[#allocation2 + $0x1] sm:$0xff]  ;;  %1187 = vmatprep.subr.mxu0 %v285_v12  ;;  %v70_v20 = vld [vmem:[#allocation2 + $0x9] sm:$0xff]  ;;  %v62_v35 = vld [vmem:[#allocation6 + $0x8] sm:$0xff]  ;;  %vm766_vm6 = vcmp.eq.s32.totalorder %v650_v52, %v1409_v43  ;;  %v636_v57 = vand.u32 7, %v554_v53  ;;  %v552_v58 = vadd.s32 64, %v1407_v42  ;;  %vm765_vm7 = vcmp.eq.s32.totalorder %v643_v55, %v1409_v43 }
  0x27   :  { %1147 = vmatprep.subr.mxu1 %v76_v14  ;;  %1153 = vmatprep.mubr.msk.f32.mxu1 %vm52_vm1, %v69_v16  ;;  %v65_v28 = vld [vmem:[#allocation6 + $0x20] sm:$0xff]  ;;  %v57_v29 = vld [vmem:[#allocation2] sm:$0xff]  ;;  %v58_v38 = vld [vmem:[#allocation2 + $0x8] sm:$0xff]  ;;  %v629_v59 = vand.u32 7, %v553_v56  ;;  %v551_v60 = vadd.s32 56, %v1407_v42  ;;  %v550_v62 = vadd.s32 48, %v1407_v42 }
  0x28   :  { %1148 = vmatpush3.msra.mxu1 %v76_v14  ;;  %1188 = vmatpush3.msra.mxu0 %v285_v12  ;;  %v276_v31 = vld [vmem:[#allocation2 + $0x2] sm:$0xff]  ;;  %v277_v32 = vld [vmem:[#allocation2 + $0xa] sm:$0xff]  ;;  %vm764_vm8 = vcmp.eq.s32.totalorder %v636_v57, %v1409_v43  ;;  %v622_v61 = vand.u32 7, %v552_v58  ;;  %v896_v45 = vand.u32 7, %v1409_v43  ;;  %v878_v53 = vld [vmem:[%s1535_s2] sm:$0x1] }
  0x29   :  { %1149 = vmatprep.subr.mxu1 %v75_v15  ;;  %1189 = vmatprep.subr.mxu0 %v284_v17  ;;  %v71_v22 = vld [vmem:[#allocation2 + $0x19] sm:$0xff]  ;;  %v72_v26 = vld [vmem:[#allocation2 + $0x21] sm:$0xff]  ;;  %v61_v37 = vld [vmem:[#allocation6] sm:$0xff]  ;;  %vm763_vm9 = vcmp.eq.s32.totalorder %v629_v59, %v1409_v43  ;;  %v615_v63 = vand.u32 7, %v551_v60  ;;  %v608_v1 = vand.u32 7, %v550_v62  ;;  %v983_v60 = vsub.s32 0, %v1407_v42 }
  0x2a   :  { %1150 = vmatpush3.msra.mxu1 %v75_v15  ;;  %1190 = vmatpush3.msra.mxu0 %v284_v17  ;;  %v63_v33 = vld [vmem:[#allocation6 + $0x10] sm:$0xff]  ;;  %v59_v39 = vld [vmem:[#allocation2 + $0x18] sm:$0xff]  ;;  %vm762_vm10 = vcmp.eq.s32.totalorder %v622_v61, %v1409_v43  ;;  %v991_v61 = vsub.s32 1, %v1407_v42 }
  0x2b   :  { %1151 = vmatprep.subr.mxu1 %v74_v18  ;;  %1191 = vmatprep.subr.mxu0 %v283_v19  ;;  %v278_v34 = vld [vmem:[#allocation2 + $0x1a] sm:$0xff]  ;;  %v279_v36 = vld [vmem:[#allocation2 + $0x22] sm:$0xff]  ;;  %vm761_vm11 = vcmp.eq.s32.totalorder %v615_v63, %v1409_v43  ;;  %vm760_vm12 = vcmp.eq.s32.totalorder %v608_v1, %v1409_v43 }
  0x2c   :  { %1152 = vmatpush3.msra.mxu1 %v74_v18  ;;  %1192 = vmatpush3.msra.mxu0 %v283_v19  ;;  %v60_v40 = vld [vmem:[#allocation2 + $0x20] sm:$0xff] }
  0x2d   :  { %1154 = vmatmul.mubr.msk.f32.vlgmr.msra.gmra.mxu1 %vm52_vm1, %v70_v20  ;;  %1159 = vmatprep.subr.mxu1 %v68_v21 }
  0x2e   :  { %1160 = vmatpush3.msra.mxu1 %v68_v21  ;;  %1156 = vmatprep.mubr.msk.f32.mxu1 %vm52_vm1, %v71_v22 }
  0x2f   :  { %1161 = vmatprep.subr.mxu1 %v67_v23  ;;  %1193 = vmatprep.subr.mxu0 %v282_v24 }
  0x30   :  { %1162 = vmatpush3.msra.mxu1 %v67_v23  ;;  %1194 = vmatpush3.msra.mxu0 %v282_v24 }
  0x31   :  { %1163 = vmatprep.subr.mxu1 %v66_v25  ;;  %1157 = vmatmul.mubr.msk.f32.gmra.mxu1 %vm52_vm1, %v72_v26  ;;  %v549_v26 = vadd.s32 40, %v1407_v42 }
  0x32   :  { %1164 = vmatpush3.msra.mxu1 %v66_v25  ;;  %1195 = vmatprep.subr.mxu0 %v281_v27 }
  0x33   :  { %1165 = vmatprep.subr.mxu1 %v65_v28  ;;  %1175 = vmatprep.mubr.msk.f32.mxu1 %vm52_vm1, %v57_v29 }
  0x34   :  { %1166 = vmatpush3.msra.mxu1 %v65_v28  ;;  %1196 = vmatpush3.msra.mxu0 %v281_v27  ;;  %v601_v27 = vand.u32 7, %v549_v26  ;;  %v548_v28 = vadd.s32 32, %v1407_v42 }
  0x35   :  { %1167 = vmatprep.subr.mxu1 %v64_v30  ;;  %1197 = vmatprep.mubr.msk.f32.mxu0 %vm52_vm1, %v276_v31 }
  0x36   :  { %1168 = vmatpush3.msra.mxu1 %v64_v30  ;;  %1198 = vmatmul.mubr.msk.f32.vlgmr.msra.gmra.mxu0 %vm52_vm1, %v277_v32  ;;  %vm759_vm14 = vcmp.eq.s32.totalorder %v601_v27, %v1409_v43  ;;  %v594_v29 = vand.u32 7, %v548_v28  ;;  %v547_v30 = vadd.s32 24, %v1407_v42  ;;  %v546_v32 = vadd.s32 16, %v1407_v42 }
  0x37   :  { %1169 = vmatprep.subr.mxu1 %v63_v33  ;;  %1200 = vmatprep.mubr.msk.f32.mxu0 %vm52_vm1, %v278_v34  ;;  %v545_v34 = vadd.s32 8, %v1407_v42 }
  0x38   :  { %1170 = vmatpush3.msra.mxu1 %v63_v33  ;;  %1225 = vmatprep.subr.mxu0 %v1345_v0  ;;  %vm758_vm15 = vcmp.eq.s32.totalorder %v594_v29, %v1409_v43  ;;  %v587_v31 = vand.u32 7, %v547_v30  ;;  %v580_v33 = vand.u32 7, %v546_v32 }
  0x39   :  { %1171 = vmatprep.subr.mxu1 %v62_v35  ;;  %1226 = vmatpush3.msk.msra.mxu0 %vm769_vm3, %v1347_v54 }
  0x3a   :  { %1172 = vmatpush3.msra.mxu1 %v62_v35  ;;  %1201 = vmatmul.mubr.msk.f32.gmra.mxu0 %vm52_vm1, %v279_v36  ;;  %vm757_vm0 = vcmp.eq.s32.totalorder %v587_v31, %v1409_v43  ;;  %v573_v35 = vand.u32 7, %v545_v34  ;;  %v566_v36 = vand.u32 7, %v1407_v42 }
  0x3b   :  { %1173 = vmatprep.subr.mxu1 %v61_v37  ;;  %1257 = vmatprep.mubr.msk.f32.mxu0 %vm1346_vm2, %v1345_v0 }
  0x3c   :  { %1174 = vmatpush3.msra.mxu1 %v61_v37  ;;  %1227 = vmatprep.subr.mxu0 %v1345_v0  ;;  %vm754_vm3 = vcmp.eq.s32.totalorder %v566_v36, %v1409_v43 }
  0x3d   :  { %1176 = vmatmul.mubr.msk.f32.vlgmr.msra.gmra.mxu1 %vm52_vm1, %v58_v38  ;;  %1203 = vmatprep.subr.mxu1 %v1345_v0 }
  0x3e   :  { %1178 = vmatprep.mubr.msk.f32.mxu1 %vm52_vm1, %v59_v39  ;;  %1228 = vmatpush3.msk.msra.mxu0 %vm768_vm4, %v1347_v54  ;;  %vm541_vm4 = vcmask 1040384  }
  0x3f   :  { %1229 = vmatprep.subr.mxu0 %v1345_v0 }
  0x40   :  { %1230 = vmatpush3.msk.msra.mxu0 %vm767_vm5, %v1347_v54  ;;  %vm904_vm5 = vcmp.eq.s32.totalorder %v896_v45, %v1407_v42 }
  0x41   :  { %1179 = vmatmul.mubr.msk.f32.gmra.mxu1 %vm52_vm1, %v60_v40  ;;  %1231 = vmatprep.subr.mxu0 %v1345_v0  ;;  %vm756_vm1 = vcmp.eq.s32.totalorder %v580_v33, %v1409_v43 }
  0x42   :  { %1211 = vmatprep.mubr.msk.f32.mxu1 %vm1346_vm2, %v1345_v0  ;;  %1232 = vmatpush3.msk.msra.mxu0 %vm766_vm6, %v1347_v54  ;;  %vm907_vm6 = vcmask 64512  }
  0x43   :  { %1233 = vmatprep.subr.mxu0 %v1345_v0 }
  0x44   :  { %1234 = vmatpush3.msk.msra.mxu0 %vm765_vm7, %v1347_v54 }
  0x45   :  { %1235 = vmatprep.subr.mxu0 %v1345_v0 }
  0x46   :  { %1236 = vmatpush3.msk.msra.mxu0 %vm764_vm8, %v1347_v54 }
  0x47   :  { %1237 = vmatprep.subr.mxu0 %v1345_v0 }
  0x48   :  { %1238 = vmatpush3.msk.msra.mxu0 %vm763_vm9, %v1347_v54 }
  0x49   :  { %1239 = vmatprep.subr.mxu0 %v1345_v0 }
  0x4a   :  { %1240 = vmatpush3.msk.msra.mxu0 %vm762_vm10, %v1347_v54 }
  0x4b   :  { %1241 = vmatprep.subr.mxu0 %v1345_v0 }
  0x4c   :  { %1242 = vmatpush3.msk.msra.mxu0 %vm761_vm11, %v1347_v54 }
  0x4d   :  { %1243 = vmatprep.subr.mxu0 %v1345_v0 }
  0x4e   :  { %1244 = vmatpush3.msk.msra.mxu0 %vm760_vm12, %v1347_v54 }
  0x4f   :  { %1245 = vmatprep.subr.mxu0 %v1345_v0 }
  0x50   :  { %1246 = vmatpush3.msk.msra.mxu0 %vm759_vm14, %v1347_v54 }
  0x51   :  { %1247 = vmatprep.subr.mxu0 %v1345_v0 }
  0x52   :  { %1248 = vmatpush3.msk.msra.mxu0 %vm758_vm15, %v1347_v54 }
  0x53   :  { %1249 = vmatprep.subr.mxu0 %v1345_v0 }
  0x54   :  { %1250 = vmatpush3.msk.msra.mxu0 %vm757_vm0, %v1347_v54 }
  0x55   :  { %1251 = vmatprep.subr.mxu0 %v1345_v0 }
  0x56   :  { %1252 = vmatpush3.msk.msra.mxu0 %vm756_vm1, %v1347_v54 }
  0x57   :  { %1253 = vmatprep.subr.mxu0 %v1345_v0 }
  0xed   :  { %v1155_v2 = vpop.f32.mrf.mxu1 }
  0xef   :  { %v160_v3 = vpop.f32.mrf.mxu1 }
  0xf1   :  { %v1158_v4 = vpop.f32.mrf.mxu1 }
  0xf3   :  { %v170_v6 = vpop.f32.mrf.mxu1 }
  0xf6   :  { %v1199_v5 = vpop.f32.mrf.mxu0 }
  0xf8   :  { %v367_v8 = vpop.f32.mrf.mxu0 }
  0xfa   :  { %v1202_v11 = vpop.f32.mrf.mxu0 }
  0xfc   :  { %v377_v17 = vpop.f32.mrf.mxu0 }
  0xfd   :  { %v1177_v7 = vpop.f32.mrf.mxu1 }
  0xfe   :  { %v263_v14 = vadd.f32 %v1177_v7, %v1155_v2 }
  0xff   :  { %v257_v9 = vpop.f32.mrf.mxu1 }
 0x100   :  { %v258_v18 = vadd.f32 %v257_v9, %v160_v3  ;;  %v1457_v20 = vadd.f32 %v1199_v5, %v263_v14 }
 0x101   :  { %v1180_v10 = vpop.f32.mrf.mxu1 }
 0x102   :  { %v273_v12 = vadd.f32 %v1180_v10, %v1158_v4  ;;  %v1461_v21 = vadd.f32 %v367_v8, %v258_v18  ;;  %v465_v24 = vmul.f32 %v1457_v20, %v1457_v20 }
 0x103   :  { %v267_v13 = vpop.f32.mrf.mxu1 }
 0x104   :  { %v1451_v15 = vadd.f32 %v1202_v11, %v273_v12  ;;  %v268_v16 = vadd.f32 %v267_v13, %v170_v6  ;;  %v464_v25 = vmul.f32 %v1461_v21, %v1461_v21 }
 0x106   :  { %v1453_v19 = vadd.f32 %v377_v17, %v268_v16  ;;  %1204 = vmatpush3.msra.mxu1 %v1451_v15  ;;  %v467_v22 = vmul.f32 %v1451_v15, %v1451_v15 }
 0x107   :  { %1205 = vmatprep.subr.mxu1 %v1345_v0 }
 0x108   :  { %1206 = vmatpush3.msra.mxu1 %v1453_v19  ;;  %v466_v23 = vmul.f32 %v1453_v19, %v1453_v19 }
 0x109   :  { %1207 = vmatprep.subr.mxu1 %v1345_v0 }
 0x10a   :  { %1208 = vmatpush3.msra.mxu1 %v1457_v20 }
 0x10b   :  { %1209 = vmatprep.subr.mxu1 %v1345_v0 }
 0x10c   :  { %1210 = vmatpush3.msra.mxu1 %v1461_v21 }
 0x10d   :  { %1212 = vmatmul.mubr.msk.f32.vlgmr.msra.gmra.mxu1 %vm390_vm13, %v1347_v54  ;;  %1214 = vmatprep.subr.mxu1 %v1345_v0 }
 0x10e   :  { %1215 = vmatpush3.msra.mxu1 %v467_v22  ;;  %1222 = vmatprep.mubr.msk.f32.mxu1 %vm1346_vm2, %v1345_v0 }
 0x10f   :  { %1216 = vmatprep.subr.mxu1 %v1345_v0 }
 0x110   :  { %1217 = vmatpush3.msra.mxu1 %v466_v23 }
 0x111   :  { %1218 = vmatprep.subr.mxu1 %v1345_v0 }
 0x112   :  { %1219 = vmatpush3.msra.mxu1 %v465_v24 }
 0x113   :  { %1220 = vmatprep.subr.mxu1 %v1345_v0 }
 0x114   :  { %1221 = vmatpush3.msra.mxu1 %v464_v25 }
 0x115   :  { %1223 = vmatmul.mubr.msk.f32.vlgmr.msra.gmra.mxu1 %vm390_vm13, %v1347_v54  ;;  %1260 = vmatprep.subr.mxu1 %v1345_v0 }
 0x116   :  { %1262 = vmatprep.mubr.msk.f32.mxu1 %vm1346_vm2, %v1345_v0  ;;  %vm755_vm2 = vcmp.eq.s32.totalorder %v573_v35, %v1409_v43  ;;  %1261 = vmatpush3.msk.msra.mxu1 %vm904_vm5, %v1347_v54  ;;  %v885_v43 = vld [vmem:[%s1535_s2 + $0x1] sm:$0x1]  ;;  %s1348_s2 = smov [#allocation8]  }
 0x117   :  { %1254 = vmatpush3.msk.msra.mxu0 %vm755_vm2, %v1347_v54  ;;  %s1010_s26 = sshll.u32 %s1348_s2, 4  ;;  %s1011_s26 = int_to_ptr.vmem [resolvable:$true] %s1010_s26 }
 0x118   :  { %1255 = vmatprep.subr.mxu0 %v1345_v0  ;;  %s1315_s27 = scalar_lea.vmem %s1011_s26, 512  ;;  %p1320_p11 = scmp.lt.s32.totalorder %s1011_s26, %s1011_s26 }
 0x119   :  { %1256 = vmatpush3.msk.msra.mxu0 %vm754_vm3, %v1347_v54  ;;  %p1316_p10 = scmp.ne.s32.totalorder %s1011_s26, %s1315_s27  ;;  %p1321_p12 = scmp.lt.s32.totalorder %s1315_s27, %s1315_s27 }
 0x11b   :  { %p1322_p13 = por %p1321_p12, %p1320_p11 }
 0x11d   :  { %p1323_p0 = pnand %p1322_p13, %p1316_p10 }
 0x1cd   :  { %v460_v37 = vpop.f32.mrf.mxu1 }
 0x1cf   :  { %v1213_v38 = vpop.f32.mrf.mxu1 }
 0x1d5   :  { %v534_v39 = vpop.f32.mrf.mxu1 }
 0x1d6   :  { %v539_v40 = vrot.slane %v534_v39, 7 }
 0x1d7   :  { %v1224_v41 = vpop.f32.mrf.mxu1 }
 0x1d8   :  { %v542_v44 = vsel %vm541_vm4, %v460_v37, %v539_v40 }
 0x1d9   :  { %1258 = vmatmul.mubr.f32.vlgmr.msra.gmra.mxu0 %v542_v44 }
 0x299   :  { %v868_v0 = vpop.f32.mrf.mxu0 }
 0x29a   :  { %v872_v46 = vmul.f32 0.001953125, %v868_v0 }
 0x29b   :  { %v1259_v47 = vpop.f32.mrf.mxu0 }
 0x29c   :  { %v873_v48 = vmul.f32 %v872_v46, %v872_v46 }
 0x29e   :  { %v875_v49 = vrot.slane %v873_v48, 7 }
 0x2a0   :  { %v877_v50 = vsub.f32 %v872_v46, %v875_v49 }
 0x2a2   :  { %v879_v51 = vadd.f32 1e-05, %v877_v50 }
 0x2a4   :  { %1273 = vrsqrt.f32 %v879_v51 }
 0x2b1   :  { %v1274_v52 = vpop.eup %1273 }
 0x2b2   :  { %v882_v55 = vrot.slane %v1274_v52, 1 }
 0x2b4   :  { %v884_v56 = vmul.f32 %v882_v55, %v878_v53 }
 0x2b6   :  { %v886_v54 = vmul.f32 %v884_v56, %v872_v46 }
 0x2b8   :  { %v887_v57 = vsub.f32 %v885_v43, %v886_v54 }
 0x2ba   :  { %v889_v58 = vrot.slane %v887_v57, 7 }
 0x2bc   :  { %v891_v59 = vsel %vm541_vm4, %v884_v56, %v889_v58 }
 0x2bd   :  { %1263 = vmatmul.mubr.msk.f32.vlgmr.msra.gmra.mxu1 %vm907_vm6, %v891_v59 }
 0x37d   :  { %v977_v62 = vpop.f32.mrf.mxu1 }
 0x37e   :  { %v984_v63 = vrot.slane %v977_v62, %v983_v60  ;;  %v992_v1 = vrot.slane %v977_v62, %v991_v61 }
 0x37f   :  { %v1264_v2 = vpop.f32.mrf.mxu1 }
 0x380   :  { %v985_v3 = vmul.f32 %v984_v63, %v1461_v21  ;;  %v986_v4 = vmul.f32 %v984_v63, %v1457_v20  ;;  %v987_v5 = vmul.f32 %v984_v63, %v1453_v19  ;;  %v988_v6 = vmul.f32 %v984_v63, %v1451_v15 }
 0x382   :  { %v993_v7 = vadd.f32 %v992_v1, %v985_v3  ;;  %v994_v8 = vadd.f32 %v992_v1, %v986_v4  ;;  %v995_v9 = vadd.f32 %v992_v1, %v987_v5  ;;  %v996_v10 = vadd.f32 %v992_v1, %v988_v6 }
 0x384   :  { %v997_v11 = vmax.f32 %v993_v7, 0.0  ;;  %v998_v42 = vmax.f32 %v994_v8, 0.0  ;;  %v999_v12 = vmax.f32 %v995_v9, 0.0  ;;  %v1000_v13 = vmax.f32 %v996_v10, 0.0 }
 0x386   :  { %1001 = vst [vmem:[#allocation8] sm:$0xff] %v997_v11  ;;  %1002 = vst [vmem:[#allocation8 + $0x8] sm:$0xff] %v998_v42 }
 0x387   :  { %1003 = vst [vmem:[#allocation8 + $0x10] sm:$0xff] %v999_v12  ;;  %1004 = vst [vmem:[#allocation8 + $0x18] sm:$0xff] %v1000_v13 }
 0x388   :  { %1326 = shalt.err (!%p1323_p0)
}
 0x389   :  { %1016 = dma.vmem_to_hbm [thread:$0]  %s1011_s26, 512, %s1536_s3, [#allocation5], %s1342_s15, %s1342_s15, %s1343_s16  }
 0x38a   :  { %1339 = dma.done.wait [#allocation5], 512  }
 0x38b   :  { %1340 = vsyncadd [#allocation5], 4294966784 }
 0x38c   :  { %1020 = vsyncpa [#allocation4], 1 }
 0x38d   :  { %1021 = vsyncpa [#allocation7], 1 }
 0x38e   :  { %1022 = vsyncpa [#allocation5], 1 }

</bundles_post_ra>
